<compile_context>
chip_gen: v7x
topology: tpu7x:2x2x1
jax: 0.10.0
libtpu: 0.0.40
codegen_flags: <defaults>
</compile_context>

<pallas_src>
import math
import functools

import jax
import jax.numpy as jnp
from jax import lax
from jax.experimental import pallas as pl
from jax.experimental.pallas import tpu as pltpu


# ---------------------------------------------------------------------------
# Kernels
# ---------------------------------------------------------------------------

def _norm_rowwise_kernel(x_ref, o_ref, *, eps_exp: float, inv_c: float):
    """One norm per block row; reduction over the (full) last axis."""
    x = x_ref[...]                                   # (tile_rows, C), native dtype
    xf = x.astype(jnp.float32)
    mean_sq = jnp.sum(xf * xf, axis=-1, keepdims=True) * inv_c   # f32 accumulation
    scales = lax.rsqrt(mean_sq + eps_exp)
    # Multiply in f32 and cast exactly once at the store.
    o_ref[...] = (xf * scales).astype(o_ref.dtype)


def _norm_packed_kernel(x_ref, o_ref, *, eps_exp: float, inv_c: float,
                        c: int, gc: int):
    """Lane-dense path for small C.

    G = gc // c logical rows are packed per block row, so the block is
    (tile_rows, gc) with gc a multiple of 128 and the output store is a full
    unmasked vst.  The per-segment sum of squares is one small MXU matmul
    against a block-diagonal 0/1 matrix (the MXU has huge slack in this
    HBM-bound kernel), which keeps everything in a native 2-D lane layout and
    avoids in-kernel reshapes/relayouts.  Building the matrix is a handful of
    vreg ops per grid step — negligible vs. the multi-MiB block DMA.
    """
    x = x_ref[...]                                   # (tile_rows, gc)
    xf = x.astype(jnp.float32)
    sq = xf * xf
    # c divides 128 so it is a power of two: lanes i, j share a segment iff
    # (i ^ j) < c.  S[i, j] = 1.0 on same-segment pairs, else 0.
    lane_i = lax.broadcasted_iota(jnp.int32, (gc, gc), 0)
    lane_j = lax.broadcasted_iota(jnp.int32, (gc, gc), 1)
    seg_sum_mat = ((lane_i ^ lane_j) < c).astype(jnp.float32)
    # (tile, gc) @ (gc, gc): per-segment sums of squares, broadcast back onto
    # every lane of the segment.  (f32 MXU matmul; bf16-pass precision gives
    # <=~1e-3 relative error on the scale, fine for a norm.)
    sum_sq = jnp.dot(sq, seg_sum_mat, preferred_element_type=jnp.float32)
    scales = lax.rsqrt(sum_sq * inv_c + eps_exp)
    o_ref[...] = (xf * scales).astype(o_ref.dtype)


# ---------------------------------------------------------------------------
# Tiling / VMEM budgeting
# ---------------------------------------------------------------------------

def _sublane_min(dtype) -> int:
    # 8 for 32-bit, 16 for 16-bit, 32 for 8-bit dtypes.
    bits = jnp.dtype(dtype).itemsize * 8
    return max(8, 256 // bits)


def _vmem_capacity_bytes() -> int:
    try:
        cap = int(pltpu.get_tpu_info().vmem_capacity_bytes)
        if cap > 0:
            return cap
    except Exception:
        pass
    return 128 << 20          # v5e / v6e default if the query is unavailable


def _budgets() -> tuple[int, int]:
    """Generation-aware (vmem_limit_bytes, per-step block byte budget)."""
    cap = _vmem_capacity_bytes()
    # v7x (64 MiB physical)  -> limit ~40 MiB.
    # v5e/v6e (128 MiB)      -> limit ~80 MiB.
    vmem_limit = min(96 << 20, (cap * 5) // 8)
    block_budget = (vmem_limit * 3) // 4       # headroom for Mosaic scratch
    return vmem_limit, block_budget


def _pick_tile_rows(rows: int, c: int, dtype, block_budget_bytes: int) -> int:
    """Byte-based tile sizing: fill the VMEM block budget, no fixed row cap."""
    sub = _sublane_min(dtype)
    itemsize = jnp.dtype(dtype).itemsize
    # Per-row footprint: in + out blocks, double-buffered each (4 * itemsize),
    # plus a single-buffered f32 upcast copy only for sub-32-bit inputs (for
    # f32 the astype is a no-op and square+reduce fuse in-register).
    upcast = 4 if itemsize < 4 else 0
    bytes_per_row = c * (4 * itemsize + upcast)
    cap = block_budget_bytes // max(bytes_per_row, 1)
    # Keep the *input* block itself <= 16 MiB; roofline is flat beyond a few MiB.
    cap = min(cap, (16 << 20) // max(c * itemsize, 1))
    rows_rounded = ((rows + sub - 1) // sub) * sub
    tile = min(cap, rows_rounded)
    return max(sub, (tile // sub) * sub)


# ---------------------------------------------------------------------------
# Wrapper
# ---------------------------------------------------------------------------

def non_scaled_norm(x: jnp.ndarray, num_channels: int, eps_exp: float,
                    channel_dim: int = -1, tile_rows: int | None = None,
                    vmem_limit_bytes: int | None = None) -> jnp.ndarray:
    """Pallas implementation of NonScaledNorm.forward."""
    assert x.shape[channel_dim] == num_channels

    # TODO(synk): avoid this moveaxis (two extra HBM passes) with an in-kernel
    # sublane-axis reduction variant for non-channels-last callers.
    moved = channel_dim not in (-1, x.ndim - 1)
    if moved:
        x = jnp.moveaxis(x, channel_dim, -1)

    orig_shape = x.shape
    rows = math.prod(orig_shape[:-1])
    C = orig_shape[-1]

    auto_vmem_limit, block_budget = _budgets()
    if vmem_limit_bytes is None:
        vmem_limit_bytes = auto_vmem_limit

    # Lane-dense packing for small C: fold G = 128 // C logical rows into each
    # block row so the output last dim is a full 128 lanes (unmasked stores).
    # The reshape (rows, C) -> (rows/G, G*C) is row-major contiguous => free.
    pack = 1
    if C < 128 and 128 % C == 0 and rows % (128 // C) == 0:
        pack = 128 // C
    packed_rows = rows // pack
    packed_c = C * pack

    x2d = x.reshape(packed_rows, packed_c)

    if tile_rows is None:
        tile_rows = _pick_tile_rows(packed_rows, packed_c, x.dtype, block_budget)
    sub = _sublane_min(x.dtype)
    assert tile_rows % sub == 0, (
        f"tile_rows={tile_rows} must be a multiple of {sub} for dtype {x.dtype}")

    grid = (pl.cdiv(packed_rows, tile_rows),)   # ragged last block handled by Pallas

    if pack == 1:
        kernel = functools.partial(_norm_rowwise_kernel,
                                   eps_exp=float(eps_exp), inv_c=1.0 / float(C))
    else:
        kernel = functools.partial(_norm_packed_kernel,
                                   eps_exp=float(eps_exp), inv_c=1.0 / float(C),
                                   c=int(C), gc=int(packed_c))

    itemsize = jnp.dtype(x.dtype).itemsize
    cost = pl.CostEstimate(
        flops=int(3 * rows * C),            # square + reduce-add + scale multiply
        transcendentals=int(rows),          # one rsqrt per row
        bytes_accessed=int(2 * rows * C * itemsize),
    )

    out2d = pl.pallas_call(
        kernel,
        out_shape=jax.ShapeDtypeStruct((packed_rows, packed_c), x.dtype),
        grid_spec=pltpu.PrefetchScalarGridSpec(
            num_scalar_prefetch=0,
            grid=grid,
            in_specs=[pl.BlockSpec((tile_rows, packed_c), lambda i: (i, 0))],
            out_specs=pl.BlockSpec((tile_rows, packed_c), lambda i: (i, 0)),
        ),
        compiler_params=pltpu.CompilerParams(
            # TODO(synk): verify in xprof that this parallel row axis shards
            # across both v7x TensorCores; if one TC idles, add an explicit
            # CORE_PARALLEL leading grid axis of size 2.
            dimension_semantics=("parallel",),
            vmem_limit_bytes=int(vmem_limit_bytes),
        ),
        cost_estimate=cost,
    )(x2d)

    out = out2d.reshape(orig_shape)
    if moved:
        out = jnp.moveaxis(out, -1, channel_dim)
    return out


# ---------------------------------------------------------------------------
# Reference + tests
# ---------------------------------------------------------------------------

def _reference(x, eps_exp, axis=-1):
    xf = x.astype(jnp.float32)
    scales = jax.lax.rsqrt(jnp.mean(xf * xf, axis=axis, keepdims=True) + eps_exp)
    return (xf * scales).astype(x.dtype)


if __name__ == "__main__":
    eps_exp = math.exp(-0.25)   # BasicNorm default eps=-0.25 -> eps.exp()
    key = jax.random.PRNGKey(0)
    k1, k2, k3, k4, k5 = jax.random.split(key, 5)

    # 1) Small C -> packed lane-dense path (G = 128 / 32 = 4).
    x1 = jax.random.normal(k1, (2, 8, 32), dtype=jnp.float32)
    y1 = jax.block_until_ready(non_scaled_norm(x1, num_channels=32, eps_exp=eps_exp))
    # Segment sum goes through the MXU; f32 matmul may run at bf16-pass
    # precision (~1e-3 relative on the scale), acceptable for a norm.
    assert jnp.allclose(y1, _reference(x1, eps_exp), atol=1e-2, rtol=1e-2)

    # 2) C >= 128, rows not a multiple of the tile -> ragged last block.
    x2 = jax.random.normal(k2, (3, 50, 256), dtype=jnp.float32)
    y2 = jax.block_until_ready(
        non_scaled_norm(x2, num_channels=256, eps_exp=eps_exp, tile_rows=64))
    assert jnp.allclose(y2, _reference(x2, eps_exp), atol=1e-5, rtol=1e-5)

    # 3) bf16 input, lane-dense C=128 (f32 accumulation, single cast at store).
    x3 = jax.random.normal(k3, (4, 32, 128), dtype=jnp.float32).astype(jnp.bfloat16)
    y3 = jax.block_until_ready(non_scaled_norm(x3, num_channels=128, eps_exp=eps_exp))
    assert jnp.allclose(y3.astype(jnp.float32),
                        _reference(x3, eps_exp).astype(jnp.float32),
                        atol=2e-2, rtol=2e-2)

    # 4) rows < sublane minimum (block taller than the whole array).
    x4 = jax.random.normal(k4, (1, 1, 256), dtype=jnp.float32)
    y4 = jax.block_until_ready(non_scaled_norm(x4, num_channels=256, eps_exp=eps_exp))
    assert jnp.allclose(y4, _reference(x4, eps_exp), atol=1e-5, rtol=1e-5)

    # 5) channel_dim != -1 (moveaxis glue path).
    x5 = jax.random.normal(k5, (2, 32, 8), dtype=jnp.float32)
    y5 = jax.block_until_ready(
        non_scaled_norm(x5, num_channels=32, eps_exp=eps_exp, channel_dim=1))
    assert jnp.allclose(y5, _reference(x5, eps_exp, axis=1), atol=1e-2, rtol=1e-2)

    print("KERNEL_OK")
</pallas_src>

<mosaic_0001>
module attributes {stable_mosaic.version = 11 : i64} {
  func.func @_norm_packed_kernel(%arg0: i32, %arg1: memref<8x128xf32, #tpu.memory_space<vmem>>, %arg2: memref<8x128xf32, #tpu.memory_space<vmem>>) attributes {dimension_semantics = [#tpu.dimension_semantics<parallel>], iteration_bounds = array<i64: 1>, scalar_prefetch = 0 : i64, scratch_operands = 0 : i64, tpu.core_type = #tpu.core_type<tc>, window_params = [{transform_indices = @transform_0, window_bounds = array<i64: 8, 128>}, {transform_indices = @transform_1, window_bounds = array<i64: 8, 128>}]} {
    %c0 = arith.constant 0 : index
    %c0_0 = arith.constant 0 : index
    %0 = vector.load %arg1[%c0, %c0_0] : memref<8x128xf32, #tpu.memory_space<vmem>>, vector<8x128xf32>
    %1 = arith.mulf %0, %0 : vector<8x128xf32>
    %2 = tpu.iota {dimensions = array<i32: 0>} : vector<128x128xi32>
    %3 = tpu.iota {dimensions = array<i32: 1>} : vector<128x128xi32>
    %4 = arith.xori %2, %3 : vector<128x128xi32>
    %c32_i32 = arith.constant 32 : i32
    %5 = vector.broadcast %c32_i32 : i32 to vector<128x128xi32>
    %6 = arith.cmpi slt, %4, %5 : vector<128x128xi32>
    %7 = arith.extui %6 : vector<128x128xi1> to vector<128x128xi32>
    %8 = arith.sitofp %7 : vector<128x128xi32> to vector<128x128xf32>
    %cst = arith.constant dense<0.000000e+00> : vector<8x128xf32>
    %9 = tpu.matmul %1, %8, %cst {dimension_numbers = #tpu.dot_dimension_numbers<[1], [0], [0], [1], [0, 0, 1, 1], [], []>} : vector<8x128xf32>, vector<128x128xf32>, vector<8x128xf32> -> vector<8x128xf32>
    %cst_1 = arith.constant 3.125000e-02 : f32
    %10 = vector.broadcast %cst_1 : f32 to vector<8x128xf32>
    %11 = arith.mulf %9, %10 : vector<8x128xf32>
    %cst_2 = arith.constant 0.778800785 : f32
    %12 = vector.broadcast %cst_2 : f32 to vector<8x128xf32>
    %13 = arith.addf %11, %12 : vector<8x128xf32>
    %14 = math.rsqrt %13 : vector<8x128xf32>
    %15 = arith.mulf %0, %14 : vector<8x128xf32>
    %c0_3 = arith.constant 0 : index
    %c0_4 = arith.constant 0 : index
    %16 = vector.load %arg2[%c0_3, %c0_4] : memref<8x128xf32, #tpu.memory_space<vmem>>, vector<8x128xf32>
    tpu.vector_store %arg2[%c0_3, %c0_4], %15 {strides = array<i32>} : memref<8x128xf32, #tpu.memory_space<vmem>>, vector<8x128xf32>,
    return
  }
  func.func @transform_0(%arg0: i32) -> (i32, i32) {
    %c0_i32 = arith.constant 0 : i32
    %c0_i32_0 = arith.constant 0 : i32
    return %arg0, %c0_i32 : i32, i32
  }
  func.func @transform_1(%arg0: i32) -> (i32, i32) {
    %c0_i32 = arith.constant 0 : i32
    %c0_i32_0 = arith.constant 0 : i32
    return %arg0, %c0_i32 : i32, i32
  }
}

</mosaic_0001>

<bundles_post_ra>
// kernel: tpu_custom_call.1
= control target key start
LH: loop header
LB: loop body
LE: loop exit
PB: predicated region body
PF: predicated region fallthrough
CT: control target
= control target key end

     0   :  { %6 = vsyncpa [#allocation3], 0  ;;  %s446_s0 = inlined_call_operand.hbm [shape: f32[4,128], index: 0, kind: input, shape index: {}]   ;;  %s447_s1 = inlined_call_operand.hbm [shape: f32[4,128], index: 1, kind: output, shape index: {}]  }
   0x1   :  { %7 = vsyncpa [#allocation4], 0 }
   0x2   :  { %12 = vsyncadd [#allocation3], 64  ;;  %s366_s6 = smov [#allocation2]   ;;  %s318_s10 = scalar_lea.hbm %s446_s0, 64 }
   0x3   :  { %s13_s7 = sshll.u32 %s366_s6, 4  ;;  %p319_p0 = scmp.ne.s32.totalorder %s446_s0, %s318_s10  ;;  %s14_s7 = int_to_ptr.vmem [resolvable:$true] %s13_s7 }
   0x4   :  { %p322_p1 = scmp.lt.u32.totalorder %s318_s10, %s446_s0 }
   0x6   :  { %p324_p2 = pnand %p322_p1, %p319_p0 }
   0x8   :  { %327 = shalt.err (!%p324_p2)
}
   0x9   :  { %s328_s15 = scalar_lea.vmem %s14_s7, 64  ;;  %s332_s16 = scalar_lea.vmem %s14_s7, 128 }
   0xa   :  { %p329_p3 = scmp.ne.s32.totalorder %s14_s7, %s328_s15  ;;  %p333_p4 = scmp.lt.s32.totalorder %s14_s7, %s14_s7 }
   0xb   :  { %p334_p5 = scmp.lt.s32.totalorder %s332_s16, %s328_s15 }
   0xd   :  { %p335_p6 = por %p334_p5, %p333_p4 }
   0xf   :  { %p336_p7 = pnand %p335_p6, %p329_p3 }
  0x11   :  { %339 = shalt.err (!%p336_p7)
}
  0x12   :  { %s367_s17 = smov 64   ;;  %s368_s18 = smov 4   ;;  %v25_v0 = vlaneseq }
  0x13   :  { %19 = dma.hbm_to_vmem [thread:$0]  %s446_s0, 64, %s14_s7, [#allocation3], %s367_s17, %s367_s17, %s368_s18  }
  0x14   :  { %362 = dma.done.wait [#allocation3], 128  }
  0x15   :  { %363 = vsyncadd [#allocation3], 4294967168  ;;  %v369_v1 = vmov 0.0|0.0   ;;  %v26_v2 = vshrl.u32 %v25_v0, 7  ;;  %v400_v3 = vand.u32 127, %v25_v0  ;;  %vm370_vm0 = vmmov 0  }
  0x16   :  { %284 = vmatprep.subr.bf16.mxu0 %v369_v1  ;;  %v371_v4 = vmov 0.0   ;;  %v372_v18 = vmov 1.0|1.0   ;;  %v23_v38 = vld [vmem:[#allocation2] sm:$0xff] }
  0x17   :  { %281 = vmatprep.mubr.msk.f32.mxu0 %vm370_vm0, %v371_v4  ;;  %v27_v5 = vadd.s32 8, %v26_v2  ;;  %v44_v6 = vxor.u32 %v400_v3, %v26_v2  ;;  %v28_v7 = vadd.s32 16, %v26_v2  ;;  %v29_v8 = vadd.s32 24, %v26_v2 }
  0x18   :  { %v30_v9 = vadd.s32 32, %v26_v2  ;;  %v31_v10 = vadd.s32 40, %v26_v2  ;;  %v32_v15 = vadd.s32 48, %v26_v2  ;;  %v33_v16 = vadd.s32 56, %v26_v2 }
  0x19   :  { %v45_v11 = vxor.u32 %v400_v3, %v27_v5  ;;  %vm60_vm1 = vcmp.lt.s32.totalorder %v44_v6, 32  ;;  %v46_v12 = vxor.u32 %v400_v3, %v28_v7  ;;  %v47_v13 = vxor.u32 %v400_v3, %v29_v8 }
  0x1a   :  { %v48_v14 = vxor.u32 %v400_v3, %v30_v9  ;;  %v49_v17 = vxor.u32 %v400_v3, %v31_v10  ;;  %v50_v19 = vxor.u32 %v400_v3, %v32_v15  ;;  %v51_v20 = vxor.u32 %v400_v3, %v33_v16 }
  0x1b   :  { %vm61_vm2 = vcmp.lt.s32.totalorder %v45_v11, 32  ;;  %vm62_vm3 = vcmp.lt.s32.totalorder %v46_v12, 32  ;;  %vm63_vm4 = vcmp.lt.s32.totalorder %v47_v13, 32  ;;  %v34_v21 = vadd.s32 64, %v26_v2 }
  0x1c   :  { %vm285_vm5 = vmpackc.low %vm61_vm2, %vm60_vm1  ;;  %vm64_vm7 = vcmp.lt.s32.totalorder %v48_v14, 32  ;;  %vm65_vm8 = vcmp.lt.s32.totalorder %v49_v17, 32  ;;  %v35_v22 = vadd.s32 72, %v26_v2  ;;  %vm412_vm10 = vcmp.lt.s32.totalorder %v50_v19, 32 }
  0x1d   :  { %286 = vmatpush3.bf16.msk.msra.mxu0 %vm285_vm5, %v372_v18  ;;  %vm288_vm6 = vmpackc.low %vm63_vm4, %vm62_vm3  ;;  %vm67_vm11 = vcmp.lt.s32.totalorder %v51_v20, 32  ;;  %v52_v24 = vxor.u32 %v400_v3, %v34_v21  ;;  %v36_v26 = vadd.s32 80, %v26_v2  ;;  %v37_v27 = vadd.s32 88, %v26_v2 }
  0x1e   :  { %287 = vmatprep.subr.bf16.mxu0 %v369_v1  ;;  %vm291_vm9 = vmpackc.low %vm65_vm8, %vm64_vm7  ;;  %v53_v25 = vxor.u32 %v400_v3, %v35_v22  ;;  %v38_v28 = vadd.s32 96, %v26_v2  ;;  %v39_v29 = vadd.s32 104, %v26_v2  ;;  %v40_v32 = vadd.s32 112, %v26_v2 }
  0x1f   :  { %vm294_vm12 = vmpackc.low %vm67_vm11, %vm412_vm10  ;;  %vm68_vm13 = vcmp.lt.s32.totalorder %v52_v24, 32  ;;  %v54_v30 = vxor.u32 %v400_v3, %v36_v26  ;;  %v55_v31 = vxor.u32 %v400_v3, %v37_v27  ;;  %v41_v33 = vadd.s32 120, %v26_v2 }
  0x20   :  { %vm69_vm14 = vcmp.lt.s32.totalorder %v53_v25, 32  ;;  %v56_v34 = vxor.u32 %v400_v3, %v38_v28  ;;  %v57_v35 = vxor.u32 %v400_v3, %v39_v29  ;;  %v58_v36 = vxor.u32 %v400_v3, %v40_v32 }
  0x21   :  { %289 = vmatpush3.bf16.msk.msra.mxu0 %vm288_vm6, %v372_v18  ;;  %vm297_vm15 = vmpackc.low %vm69_vm14, %vm68_vm13  ;;  %vm70_vm0 = vcmp.lt.s32.totalorder %v54_v30, 32  ;;  %vm71_vm1 = vcmp.lt.s32.totalorder %v55_v31, 32  ;;  %v59_v37 = vxor.u32 %v400_v3, %v41_v33  ;;  %v24_v39 = vmul.f32 %v23_v38, %v23_v38 }
  0x22   :  { %290 = vmatprep.subr.bf16.mxu0 %v369_v1  ;;  %vm300_vm2 = vmpackc.low %vm71_vm1, %vm70_vm0  ;;  %vm72_vm3 = vcmp.lt.s32.totalorder %v56_v34, 32  ;;  %vm73_vm4 = vcmp.lt.s32.totalorder %v57_v35, 32  ;;  %vm74_vm6 = vcmp.lt.s32.totalorder %v58_v36, 32 }
  0x23   :  { %vm303_vm5 = vmpackc.low %vm73_vm4, %vm72_vm3  ;;  %vm75_vm7 = vcmp.lt.s32.totalorder %v59_v37, 32 }
  0x24   :  { %vm306_vm8 = vmpackc.low %vm75_vm7, %vm74_vm6 }
  0x25   :  { %292 = vmatpush3.bf16.msk.msra.mxu0 %vm291_vm9, %v372_v18 }
  0x26   :  { %293 = vmatprep.subr.bf16.mxu0 %v369_v1 }
  0x29   :  { %295 = vmatpush3.bf16.msk.msra.mxu0 %vm294_vm12, %v372_v18 }
  0x2a   :  { %296 = vmatprep.subr.bf16.mxu0 %v369_v1 }
  0x2d   :  { %298 = vmatpush3.bf16.msk.msra.mxu0 %vm297_vm15, %v372_v18 }
  0x2e   :  { %299 = vmatprep.subr.bf16.mxu0 %v369_v1 }
  0x31   :  { %301 = vmatpush3.bf16.msk.msra.mxu0 %vm300_vm2, %v372_v18 }
  0x32   :  { %302 = vmatprep.subr.bf16.mxu0 %v369_v1 }
  0x35   :  { %304 = vmatpush3.bf16.msk.msra.mxu0 %vm303_vm5, %v372_v18 }
  0x36   :  { %305 = vmatprep.subr.bf16.mxu0 %v369_v1 }
  0x39   :  { %307 = vmatpush3.bf16.msk.msra.mxu0 %vm306_vm8, %v372_v18 }
  0x3c   :  { %282 = vmatmul.mubr.f32.vlgmr.msra.gmra.mrb[0].mxu0 %v24_v39 }
 0x10f   :  { %v174_v40 = vpop.f32.mrb[0].mxu0 }
 0x110   :  { %v178_v41 = vmul.f32 0.03125, %v174_v40  ;;  %v283_v42 = vpop.f32.mrb[1].mxu0 }
 0x112   :  { %v179_v43 = vadd.f32 0.7788008, %v178_v41 }
 0x114   :  { %316 = vrsqrt.f32 %v179_v43 }
 0x11e   :  { %v317_v44 = vpop.eup %316 }
 0x11f   :  { %v181_v45 = vmul.f32 %v317_v44, %v23_v38 }
 0x121   :  { %182 = vst [vmem:[#allocation5] sm:$0xff] %v181_v45 }
 0x122   :  { %187 = vsyncadd [#allocation4], 64  ;;  %s373_s0 = smov [#allocation5]  }
 0x123   :  { %s188_s21 = sshll.u32 %s373_s0, 4  ;;  %s189_s21 = int_to_ptr.vmem [resolvable:$true] %s188_s21 }
 0x124   :  { %s340_s22 = scalar_lea.vmem %s189_s21, 64  ;;  %s344_s23 = scalar_lea.vmem %s189_s21, 128 }
 0x125   :  { %p341_p8 = scmp.ne.s32.totalorder %s189_s21, %s340_s22  ;;  %p345_p9 = scmp.lt.s32.totalorder %s189_s21, %s189_s21 }
 0x126   :  { %p346_p10 = scmp.lt.s32.totalorder %s344_s23, %s340_s22 }
 0x128   :  { %p347_p11 = por %p346_p10, %p345_p9 }
 0x12a   :  { %p348_p12 = pnand %p347_p11, %p341_p8 }
 0x12c   :  { %351 = shalt.err (!%p348_p12)
}
 0x12d   :  { %s352_s26 = scalar_lea.hbm %s447_s1, 64 }
 0x12e   :  { %p353_p13 = scmp.ne.s32.totalorder %s447_s1, %s352_s26  ;;  %p356_p0 = scmp.lt.u32.totalorder %s352_s26, %s447_s1 }
 0x130   :  { %p358_p1 = pnand %p356_p0, %p353_p13 }
 0x132   :  { %361 = shalt.err (!%p358_p1)
}
 0x133   :  { %194 = dma.vmem_to_hbm [thread:$0]  %s189_s21, 64, %s447_s1, [#allocation4], %s367_s17, %s367_s17, %s368_s18  }
 0x134   :  { %364 = dma.done.wait [#allocation4], 128  }
 0x135   :  { %365 = vsyncadd [#allocation4], 4294967168 }
 0x136   :  { %198 = vsyncpa [#allocation3], 1 }
 0x137   :  { %199 = vsyncpa [#allocation4], 1 }

</bundles_post_ra>
